<compile_context>
chip_gen: v7x
topology: tpu7x:2x2x1
jax: 0.10.0
libtpu: 0.0.40
codegen_flags: <defaults>
</compile_context>

<pallas_src>
import functools
import math

import jax
import jax.numpy as jnp
from jax.experimental import pallas as pl
from jax.experimental.pallas import tpu as pltpu


# ----------------------------------------------------------------------------
# Kernels
# ----------------------------------------------------------------------------
def _ffn_resident_kernel(x_ref, w1_ref, b1_ref, w2_ref, b2_ref, o_ref, *,
                         compute_dtype):
    """W1/W2/biases fully resident in VMEM; 1-D grid over M tiles only."""
    x = x_ref[...]
    if compute_dtype is not None:
        x = x.astype(compute_dtype)
    h = jnp.dot(x, w1_ref[...], preferred_element_type=jnp.float32)
    h = h + b1_ref[...].astype(jnp.float32)
    h = h * jax.nn.sigmoid(h)                               # SiLU in f32 (EUP slot)
    h = h.astype(compute_dtype if compute_dtype is not None else w2_ref.dtype)
    out = jnp.dot(h, w2_ref[...], preferred_element_type=jnp.float32)
    o_ref[...] = (out + b2_ref[...].astype(jnp.float32)).astype(o_ref.dtype)


def _ffn_tiled_kernel_f32out(x_ref, w1_ref, b1_ref, w2_ref, b2_ref, o_ref, *,
                             compute_dtype):
    """Hidden-tiled path, f32 output: accumulate directly into o_ref (resident over j)."""
    j = pl.program_id(1)
    x = x_ref[...]
    if compute_dtype is not None:
        x = x.astype(compute_dtype)
    h = jnp.dot(x, w1_ref[...], preferred_element_type=jnp.float32)
    h = h + b1_ref[...].astype(jnp.float32)
    h = h * jax.nn.sigmoid(h)
    h = h.astype(compute_dtype if compute_dtype is not None else w2_ref.dtype)
    partial = jnp.dot(h, w2_ref[...], preferred_element_type=jnp.float32)

    @pl.when(j == 0)
    def _():
        o_ref[...] = partial + b2_ref[...].astype(jnp.float32)

    @pl.when(j != 0)
    def _():
        o_ref[...] += partial


def _ffn_tiled_kernel_acc(x_ref, w1_ref, b1_ref, w2_ref, b2_ref, o_ref, acc_ref, *,
                          compute_dtype):
    """Hidden-tiled path, non-f32 output: f32 VMEM accumulator across j."""
    j = pl.program_id(1)

    @pl.when(j == 0)
    def _():
        acc_ref[...] = jnp.zeros_like(acc_ref)

    x = x_ref[...]
    if compute_dtype is not None:
        x = x.astype(compute_dtype)
    h = jnp.dot(x, w1_ref[...], preferred_element_type=jnp.float32)
    h = h + b1_ref[...].astype(jnp.float32)
    h = h * jax.nn.sigmoid(h)
    h = h.astype(compute_dtype if compute_dtype is not None else w2_ref.dtype)
    acc_ref[...] += jnp.dot(h, w2_ref[...], preferred_element_type=jnp.float32)

    @pl.when(j == pl.num_programs(1) - 1)
    def _():
        o_ref[...] = (acc_ref[...] + b2_ref[...].astype(jnp.float32)).astype(o_ref.dtype)


# ----------------------------------------------------------------------------
# Helpers
# ----------------------------------------------------------------------------
def _round_up(a: int, b: int) -> int:
    return ((a + b - 1) // b) * b


def _vmem_budget_bytes():
    """(tiling budget, vmem_limit) derived from this chip's VMEM capacity."""
    try:
        cap = int(pltpu.get_tpu_info().vmem_capacity_bytes)   # 128 MiB v5e/v6e, 64 MiB v7x
    except Exception:
        cap = 64 * 1024 * 1024                                # conservative (v7x-safe)
    return int(cap * 0.70), int(cap * 0.85)


def _row_align(dtype) -> int:
    isz = jnp.dtype(dtype).itemsize
    if isz >= 4:
        return 8
    if isz == 2:
        return 16
    return 32


def _pick_tn(hidden_p: int, dim: int, w_isz: int, weight_budget: int, cap: int) -> int:
    """Largest multiple-of-128 divisor of hidden_p whose (double-buffered) W1+W2+b1+b2
    tile pair fits weight_budget. hidden_p is already a multiple of 128."""
    best = 128
    t = 128
    while t <= min(hidden_p, cap):
        if hidden_p % t == 0:
            tile_bytes = 2 * (2 * dim * t + t + dim) * w_isz
            if tile_bytes <= weight_budget:
                best = t
        t += 128
    return best


def _clamp_tm(m: int, max_rows: int, row_align: int, hard_cap: int = 2048) -> int:
    """Row tile: multiple of row_align (or full m), bounded by the VMEM-derived row
    budget; for large M guarantee >=2 tiles so v7x's two TensorCores both get work."""
    cap = max(row_align, (min(max_rows, hard_cap) // row_align) * row_align)
    if m <= cap:
        tm = m
        if m >= 256:                       # split the parallel M axis across 2 TCs
            tm = _round_up(pl.cdiv(m, 2), row_align)
    else:
        tm = cap
    return tm


# ----------------------------------------------------------------------------
# Wrapper
# ----------------------------------------------------------------------------
def feed_forward(x, w1, b1, w2, b2, *, compute_dtype=None,
                 _force_tiled=False, _max_tn=None):
    """x: (..., dim). Returns SiLU(x @ W1 + b1) @ W2 + b2 (dropout = identity)."""
    orig_shape = x.shape
    dim = orig_shape[-1]
    hidden = w1.shape[1]
    assert w1.shape == (dim, hidden)
    assert b1.shape == (hidden,)
    assert w2.shape == (hidden, dim)
    assert b2.shape == (dim,)

    x2 = x.reshape(-1, dim)                      # lane-dense: last dim = dim
    m = x2.shape[0]
    out_dtype = x.dtype

    x_isz = jnp.dtype(x2.dtype).itemsize
    w_isz = jnp.dtype(w1.dtype).itemsize
    out_isz = jnp.dtype(out_dtype).itemsize
    h_isz = jnp.dtype(compute_dtype).itemsize if compute_dtype is not None else w_isz
    row_align = _row_align(compute_dtype if compute_dtype is not None else x2.dtype)

    budget, vmem_limit = _vmem_budget_bytes()
    weight_full_bytes = (dim * hidden + hidden + hidden * dim + dim) * w_isz

    # Resident fast path: weights loaded once, streamed never again.
    resident_footprint = 2 * weight_full_bytes          # pipeline buffer allocation
    per_row_resident = (2 * dim * x_isz                 # x tile (double-buffered)
                        + 2 * dim * out_isz             # out tile (double-buffered)
                        + hidden * 4 + hidden * h_isz   # f32 h + cast h
                        + dim * 4)                      # f32 out temporary
    resident_rows = (budget - resident_footprint) // per_row_resident
    use_resident = ((not _force_tiled)
                    and resident_footprint <= 0.6 * budget
                    and resident_rows >= min(m, 128))

    b2_2 = b2.reshape(1, dim)
    compiler = dict(vmem_limit_bytes=vmem_limit)

    if use_resident:
        tm = _clamp_tm(m, int(resident_rows), row_align)
        grid = (pl.cdiv(m, tm),)
        cost = pl.CostEstimate(
            flops=4 * m * dim * hidden,
            transcendentals=2 * m * hidden,
            bytes_accessed=m * dim * x_isz + m * dim * out_isz + weight_full_bytes,
        )
        kernel = functools.partial(_ffn_resident_kernel, compute_dtype=compute_dtype)
        out = pl.pallas_call(
            kernel,
            out_shape=jax.ShapeDtypeStruct((m, dim), out_dtype),
            grid_spec=pltpu.PrefetchScalarGridSpec(
                num_scalar_prefetch=0,
                grid=grid,
                in_specs=[
                    pl.BlockSpec((tm, dim), lambda i: (i, 0)),        # x
                    pl.BlockSpec((dim, hidden), lambda i: (0, 0)),    # W1 (resident)
                    pl.BlockSpec((1, hidden), lambda i: (0, 0)),      # b1
                    pl.BlockSpec((hidden, dim), lambda i: (0, 0)),    # W2 (resident)
                    pl.BlockSpec((1, dim), lambda i: (0, 0)),         # b2
                ],
                out_specs=pl.BlockSpec((tm, dim), lambda i: (i, 0)),
            ),
            compiler_params=pltpu.CompilerParams(
                dimension_semantics=("parallel",), **compiler),
            cost_estimate=cost,
        )(x2, w1, b1.reshape(1, hidden), w2, b2_2)
        return out.reshape(orig_shape)

    # ---------------- tiled fallback: reduce over hidden tiles -------------------
    hidden_p = _round_up(hidden, 128)
    if hidden_p != hidden:
        pad = hidden_p - hidden
        w1 = jnp.pad(w1, ((0, 0), (0, pad)))     # padded cols -> h=0 -> SiLU(0)=0
        b1 = jnp.pad(b1, ((0, pad),))
        w2 = jnp.pad(w2, ((0, pad), (0, 0)))

    tn_cap = _max_tn if _max_tn is not None else 2048
    tn = _pick_tn(hidden_p, dim, w_isz, int(budget * 0.5), tn_cap)
    w_tile_bytes = 2 * (2 * dim * tn + tn + dim) * w_isz

    f32_direct = jnp.dtype(out_dtype) == jnp.dtype(jnp.float32)
    acc_row = 0 if f32_direct else dim * 4
    per_row = (2 * dim * x_isz + 2 * dim * out_isz + acc_row
               + tn * 4 + tn * h_isz + dim * 4)
    act_budget = max(budget - w_tile_bytes, per_row * row_align)
    tm = _clamp_tm(m, act_budget // per_row, row_align)
    n_m_tiles = pl.cdiv(m, tm)
    grid = (n_m_tiles, hidden_p // tn)

    cost = pl.CostEstimate(
        flops=4 * m * dim * hidden,
        transcendentals=2 * m * hidden,
        bytes_accessed=(m * dim * x_isz + m * dim * out_isz
                        + int(n_m_tiles) * weight_full_bytes),
    )

    if f32_direct:
        kernel = functools.partial(_ffn_tiled_kernel_f32out, compute_dtype=compute_dtype)
        scratch = []
    else:
        kernel = functools.partial(_ffn_tiled_kernel_acc, compute_dtype=compute_dtype)
        scratch = [pltpu.VMEM((tm, dim), jnp.float32)]

    out = pl.pallas_call(
        kernel,
        out_shape=jax.ShapeDtypeStruct((m, dim), out_dtype),
        grid_spec=pltpu.PrefetchScalarGridSpec(
            num_scalar_prefetch=0,
            grid=grid,
            in_specs=[
                pl.BlockSpec((tm, dim), lambda i, j: (i, 0)),   # x (resident over j)
                pl.BlockSpec((dim, tn), lambda i, j: (0, j)),   # W1 tile
                pl.BlockSpec((1, tn),   lambda i, j: (0, j)),   # b1 tile
                pl.BlockSpec((tn, dim), lambda i, j: (j, 0)),   # W2 tile
                pl.BlockSpec((1, dim),  lambda i, j: (0, 0)),   # b2
            ],
            out_specs=pl.BlockSpec((tm, dim), lambda i, j: (i, 0)),
            scratch_shapes=scratch,
        ),
        compiler_params=pltpu.CompilerParams(
            dimension_semantics=("parallel", "arbitrary"), **compiler),
        cost_estimate=cost,
    )(x2, w1, b1.reshape(1, hidden_p), w2, b2_2)
    return out.reshape(orig_shape)


# ----------------------------------------------------------------------------
# Demo / correctness checks
# ----------------------------------------------------------------------------
if __name__ == "__main__":
    def _ref(x, w1, b1, w2, b2):
        xf = x.reshape(-1, x.shape[-1]).astype(jnp.float32)
        h = xf @ w1.astype(jnp.float32) + b1.astype(jnp.float32)
        h = h * jax.nn.sigmoid(h)                      # SiLU
        o = h @ w2.astype(jnp.float32) + b2.astype(jnp.float32)
        return o.reshape(x.shape)

    # Test 1: resident-weights fast path (f32), small TPU-aligned shapes.
    batch, seq, dim, hidden = 2, 8, 128, 1024
    key = jax.random.PRNGKey(0)
    kx, k1, k2, k3, k4 = jax.random.split(key, 5)
    x = jax.random.normal(kx, (batch, seq, dim), dtype=jnp.float32)
    w1 = jax.random.uniform(k1, (dim, hidden), jnp.float32, -1.0, 1.0) / math.sqrt(dim)
    b1 = jax.random.uniform(k2, (hidden,), jnp.float32, -1.0, 1.0) / math.sqrt(dim)
    w2 = jax.random.uniform(k3, (hidden, dim), jnp.float32, -1.0, 1.0) / math.sqrt(hidden)
    b2 = jax.random.uniform(k4, (dim,), jnp.float32, -1.0, 1.0) / math.sqrt(hidden)

    out1 = jax.block_until_ready(feed_forward(x, w1, b1, w2, b2))
    ref1 = _ref(x, w1, b1, w2, b2)
    assert out1.shape == (batch, seq, dim)
    assert bool(jnp.all(jnp.isfinite(out1))), "non-finite output (test 1)"
    assert jnp.allclose(out1, ref1, atol=2e-2, rtol=2e-2), "mismatch (test 1)"

    # Test 2: tiled-reduction path, f32 output accumulated directly into o_ref.
    hidden2 = 512
    k5, k6, k7, k8 = jax.random.split(jax.random.PRNGKey(1), 4)
    w1b = jax.random.uniform(k5, (dim, hidden2), jnp.float32, -1.0, 1.0) / math.sqrt(dim)
    b1b = jax.random.uniform(k6, (hidden2,), jnp.float32, -1.0, 1.0) / math.sqrt(dim)
    w2b = jax.random.uniform(k7, (hidden2, dim), jnp.float32, -1.0, 1.0) / math.sqrt(hidden2)
    b2b = jax.random.uniform(k8, (dim,), jnp.float32, -1.0, 1.0) / math.sqrt(hidden2)
    out2 = jax.block_until_ready(
        feed_forward(x, w1b, b1b, w2b, b2b, _force_tiled=True, _max_tn=128))
    ref2 = _ref(x, w1b, b1b, w2b, b2b)
    assert jnp.allclose(out2, ref2, atol=2e-2, rtol=2e-2), "mismatch (test 2)"

    # Test 3: tiled path, bf16 + hidden not a multiple of 128 (zero-padded).
    hidden3 = 320
    k9, k10, k11, k12, k13 = jax.random.split(jax.random.PRNGKey(2), 5)
    xb = jax.random.normal(k9, (batch, seq, dim), dtype=jnp.bfloat16)
    w1c = (jax.random.uniform(k10, (dim, hidden3), jnp.float32, -1.0, 1.0)
           / math.sqrt(dim)).astype(jnp.bfloat16)
    b1c = (jax.random.uniform(k11, (hidden3,), jnp.float32, -1.0, 1.0)
           / math.sqrt(dim)).astype(jnp.bfloat16)
    w2c = (jax.random.uniform(k12, (hidden3, dim), jnp.float32, -1.0, 1.0)
           / math.sqrt(hidden3)).astype(jnp.bfloat16)
    b2c = (jax.random.uniform(k13, (dim,), jnp.float32, -1.0, 1.0)
           / math.sqrt(hidden3)).astype(jnp.bfloat16)
    out3 = jax.block_until_ready(
        feed_forward(xb, w1c, b1c, w2c, b2c, _force_tiled=True, _max_tn=128))
    ref3 = _ref(xb, w1c, b1c, w2c, b2c)
    assert jnp.allclose(out3.astype(jnp.float32), ref3, atol=6e-2, rtol=6e-2), \
        "mismatch (test 3)"

    print("KERNEL_OK")
</pallas_src>

<mosaic_0001>
module attributes {stable_mosaic.version = 11 : i64} {
  func.func @_ffn_resident_kernel(%arg0: i32, %arg1: memref<16x128xf32, #tpu.memory_space<vmem>>, %arg2: memref<128x1024xf32, #tpu.memory_space<vmem>>, %arg3: memref<1x1024xf32, #tpu.memory_space<vmem>>, %arg4: memref<1024x128xf32, #tpu.memory_space<vmem>>, %arg5: memref<1x128xf32, #tpu.memory_space<vmem>>, %arg6: memref<16x128xf32, #tpu.memory_space<vmem>>) attributes {dimension_semantics = [#tpu.dimension_semantics<parallel>], iteration_bounds = array<i64: 1>, scalar_prefetch = 0 : i64, scratch_operands = 0 : i64, tpu.core_type = #tpu.core_type<tc>, window_params = [{transform_indices = @transform_0, window_bounds = array<i64: 16, 128>}, {pipeline_mode = #tpu.pipeline_mode<synchronous>, transform_indices = @transform_1, window_bounds = array<i64: 128, 1024>}, {pipeline_mode = #tpu.pipeline_mode<synchronous>, transform_indices = @transform_2, window_bounds = array<i64: 1, 1024>}, {pipeline_mode = #tpu.pipeline_mode<synchronous>, transform_indices = @transform_3, window_bounds = array<i64: 1024, 128>}, {pipeline_mode = #tpu.pipeline_mode<synchronous>, transform_indices = @transform_4, window_bounds = array<i64: 1, 128>}, {transform_indices = @transform_5, window_bounds = array<i64: 16, 128>}]} {
    %c0 = arith.constant 0 : index
    %c0_0 = arith.constant 0 : index
    %0 = vector.load %arg1[%c0, %c0_0] : memref<16x128xf32, #tpu.memory_space<vmem>>, vector<16x128xf32>
    %c0_1 = arith.constant 0 : index
    %c0_2 = arith.constant 0 : index
    %1 = vector.load %arg2[%c0_1, %c0_2] : memref<128x1024xf32, #tpu.memory_space<vmem>>, vector<128x1024xf32>
    %cst = arith.constant dense<0.000000e+00> : vector<16x1024xf32>
    %2 = tpu.matmul %0, %1, %cst {dimension_numbers = #tpu.dot_dimension_numbers<[1], [0], [0], [1], [0, 0, 1, 1], [], []>} : vector<16x128xf32>, vector<128x1024xf32>, vector<16x1024xf32> -> vector<16x1024xf32>
    %c0_3 = arith.constant 0 : index
    %c0_4 = arith.constant 0 : index
    %3 = vector.load %arg3[%c0_3, %c0_4] : memref<1x1024xf32, #tpu.memory_space<vmem>>, vector<1x1024xf32>
    %4 = vector.broadcast %3 : vector<1x1024xf32> to vector<16x1024xf32>
    %5 = arith.addf %2, %4 : vector<16x1024xf32>
    %6 = arith.negf %5 : vector<16x1024xf32>
    %7 = math.exp %6 : vector<16x1024xf32>
    %cst_5 = arith.constant 1.000000e+00 : f32
    %8 = vector.broadcast %cst_5 : f32 to vector<16x1024xf32>
    %9 = arith.addf %8, %7 : vector<16x1024xf32>
    %10 = arith.divf %8, %9 : vector<16x1024xf32>
    %11 = arith.mulf %5, %10 : vector<16x1024xf32>
    %c0_6 = arith.constant 0 : index
    %c0_7 = arith.constant 0 : index
    %12 = vector.load %arg4[%c0_6, %c0_7] : memref<1024x128xf32, #tpu.memory_space<vmem>>, vector<1024x128xf32>
    %cst_8 = arith.constant dense<0.000000e+00> : vector<16x128xf32>
    %13 = tpu.matmul %11, %12, %cst_8 {dimension_numbers = #tpu.dot_dimension_numbers<[1], [0], [0], [1], [0, 0, 1, 1], [], []>} : vector<16x1024xf32>, vector<1024x128xf32>, vector<16x128xf32> -> vector<16x128xf32>
    %c0_9 = arith.constant 0 : index
    %c0_10 = arith.constant 0 : index
    %14 = vector.load %arg5[%c0_9, %c0_10] : memref<1x128xf32, #tpu.memory_space<vmem>>, vector<1x128xf32>
    %15 = vector.broadcast %14 : vector<1x128xf32> to vector<16x128xf32>
    %16 = arith.addf %13, %15 : vector<16x128xf32>
    %c0_11 = arith.constant 0 : index
    %c0_12 = arith.constant 0 : index
    %17 = vector.load %arg6[%c0_11, %c0_12] : memref<16x128xf32, #tpu.memory_space<vmem>>, vector<16x128xf32>
    tpu.vector_store %arg6[%c0_11, %c0_12], %16 {strides = array<i32>} : memref<16x128xf32, #tpu.memory_space<vmem>>, vector<16x128xf32>,
    return
  }
  func.func @transform_0(%arg0: i32) -> (i32, i32) {
    %c0_i32 = arith.constant 0 : i32
    %c0_i32_0 = arith.constant 0 : i32
    return %arg0, %c0_i32 : i32, i32
  }
  func.func @transform_1(%arg0: i32) -> (i32, i32) {
    %c0_i32 = arith.constant 0 : i32
    %c0_i32_0 = arith.constant 0 : i32
    %c0_i32_1 = arith.constant 0 : i32
    return %c0_i32, %c0_i32_0 : i32, i32
  }
  func.func @transform_2(%arg0: i32) -> (i32, i32) {
    %c0_i32 = arith.constant 0 : i32
    %c0_i32_0 = arith.constant 0 : i32
    %c0_i32_1 = arith.constant 0 : i32
    return %c0_i32, %c0_i32_0 : i32, i32
  }
  func.func @transform_3(%arg0: i32) -> (i32, i32) {
    %c0_i32 = arith.constant 0 : i32
    %c0_i32_0 = arith.constant 0 : i32
    %c0_i32_1 = arith.constant 0 : i32
    return %c0_i32, %c0_i32_0 : i32, i32
  }
  func.func @transform_4(%arg0: i32) -> (i32, i32) {
    %c0_i32 = arith.constant 0 : i32
    %c0_i32_0 = arith.constant 0 : i32
    %c0_i32_1 = arith.constant 0 : i32
    return %c0_i32, %c0_i32_0 : i32, i32
  }
  func.func @transform_5(%arg0: i32) -> (i32, i32) {
    %c0_i32 = arith.constant 0 : i32
    %c0_i32_0 = arith.constant 0 : i32
    return %arg0, %c0_i32 : i32, i32
  }
}

</mosaic_0001>

<bundles_post_ra>
// kernel: tpu_custom_call.1
= control target key start
LH: loop header
LB: loop body
LE: loop exit
PB: predicated region body
PF: predicated region fallthrough
CT: control target
= control target key end

     0   :  { %10 = vsyncpa [#allocation3], 0  ;;  %s2004_s0 = inlined_call_operand.hbm [shape: f32[16,128], index: 0, kind: input, shape index: {}]   ;;  %s2005_s1 = inlined_call_operand.hbm [shape: f32[128,1024], index: 1, kind: input, shape index: {}]   ;;  %s2006_s2 = inlined_call_operand.hbm [shape: f32[1,1024], index: 2, kind: input, shape index: {}]   ;;  %s2007_s3 = inlined_call_operand.hbm [shape: f32[1024,128], index: 3, kind: input, shape index: {}]   ;;  %s2008_s4 = inlined_call_operand.vmem [shape: f32[1,128], index: 4, kind: input, shape index: {}]   ;;  %s2009_s5 = inlined_call_operand.hbm [shape: f32[16,128], index: 5, kind: output, shape index: {}]  }
   0x1   :  { %11 = vsyncpa [#allocation6], 0 }
   0x2   :  { %12 = vsyncpa [#allocation9], 0 }
   0x3   :  { %13 = vsyncpa [#allocation4], 0  ;;  %s1739_s18 = smov [#allocation5]   ;;  %s1621_s22 = scalar_lea.hbm %s2005_s1, 16384 }
   0x4   :  { %s31_s19 = sshll.u32 %s1739_s18, 4  ;;  %p1622_p0 = scmp.ne.s32.totalorder %s2005_s1, %s1621_s22  ;;  %s32_s19 = int_to_ptr.vmem [resolvable:$true] %s31_s19 }
   0x5   :  { %p1625_p1 = scmp.lt.u32.totalorder %s1621_s22, %s2005_s1 }
   0x7   :  { %p1627_p2 = pnand %p1625_p1, %p1622_p0 }
   0x9   :  { %1630 = shalt.err (!%p1627_p2)
}
   0xa   :  { %s1631_s27 = scalar_lea.vmem %s32_s19, 16384  ;;  %p1636_p4 = scmp.lt.s32.totalorder %s32_s19, %s32_s19 }
   0xb   :  { %p1632_p3 = scmp.ne.s32.totalorder %s32_s19, %s1631_s27  ;;  %p1637_p5 = scmp.lt.s32.totalorder %s1631_s27, %s1631_s27 }
   0xd   :  { %p1638_p6 = por %p1637_p5, %p1636_p4 }
   0xf   :  { %p1639_p7 = pnand %p1638_p6, %p1632_p3 }
  0x11   :  { %1642 = shalt.err (!%p1639_p7)
}
  0x12   :  { %s1740_s28 = smov 1024   ;;  %s1741_s29 = smov 64  }
  0x13   :  { %37 = dma.hbm_to_vmem [thread:$0]  %s2005_s1, 16384, %s32_s19, [#allocation6], %s1740_s28, %s1740_s28, %s1741_s29  }
  0x14   :  { %s1742_s7 = smov [#allocation2]   ;;  %s1643_s11 = scalar_lea.hbm %s2004_s0, 256 }
  0x15   :  { %s19_s8 = sshll.u32 %s1742_s7, 4  ;;  %p1644_p8 = scmp.ne.s32.totalorder %s2004_s0, %s1643_s11  ;;  %s20_s8 = int_to_ptr.vmem [resolvable:$true] %s19_s8 }
  0x16   :  { %p1647_p9 = scmp.lt.u32.totalorder %s1643_s11, %s2004_s0 }
  0x18   :  { %p1649_p10 = pnand %p1647_p9, %p1644_p8 }
  0x1a   :  { %1652 = shalt.err (!%p1649_p10)
}
  0x1b   :  { %s1653_s16 = scalar_lea.vmem %s20_s8, 256  ;;  %p1658_p12 = scmp.lt.s32.totalorder %s20_s8, %s20_s8 }
  0x1c   :  { %p1654_p11 = scmp.ne.s32.totalorder %s20_s8, %s1653_s16  ;;  %p1659_p13 = scmp.lt.s32.totalorder %s1653_s16, %s1653_s16 }
  0x1e   :  { %p1660_p0 = por %p1659_p13, %p1658_p12 }
  0x20   :  { %p1661_p1 = pnand %p1660_p0, %p1654_p11 }
  0x22   :  { %1664 = shalt.err (!%p1661_p1)
}
  0x23   :  { %s1743_s1 = smov 128   ;;  %s1744_s17 = smov 8  }
  0x24   :  { %25 = dma.hbm_to_vmem [thread:$0]  %s2004_s0, 256, %s20_s8, [#allocation3], %s1743_s1, %s1743_s1, %s1744_s17  }
  0x25   :  { %s1745_s20 = smov [#allocation7]   ;;  %s1746_s22 = smov [#allocation8]  }
  0x26   :  { %s44_s21 = sshll.u32 %s1745_s20, 4  ;;  %s53_s23 = sshll.u32 %s1746_s22, 4  ;;  %s45_s21 = int_to_ptr.vmem [resolvable:$true] %s44_s21  ;;  %s1806_s23 = int_to_ptr.vmem [resolvable:$true] %s53_s23 }
  0x27   :  { %s1665_s26 = scalar_lea.hbm %s2006_s2, 128 }
  0x28   :  { %p1666_p2 = scmp.ne.s32.totalorder %s2006_s2, %s1665_s26  ;;  %p1669_p3 = scmp.lt.u32.totalorder %s1665_s26, %s2006_s2 }
  0x2a   :  { %p1671_p4 = pnand %p1669_p3, %p1666_p2 }
  0x2c   :  { %1674 = shalt.err (!%p1671_p4)
}
  0x2d   :  { %s1675_s0 = scalar_lea.vmem %s45_s21, 128  ;;  %p1680_p6 = scmp.lt.s32.totalorder %s45_s21, %s45_s21 }
  0x2e   :  { %p1676_p5 = scmp.ne.s32.totalorder %s45_s21, %s1675_s0  ;;  %p1681_p7 = scmp.lt.s32.totalorder %s1675_s0, %s1675_s0 }
  0x30   :  { %p1682_p8 = por %p1681_p7, %p1680_p6 }
  0x32   :  { %p1683_p9 = pnand %p1682_p8, %p1676_p5 }
  0x34   :  { %1686 = shalt.err (!%p1683_p9)
}
  0x35   :  { %47 = dma.hbm_to_vmem [thread:$0]  %s2006_s2, 128, %s45_s21, [#allocation6]  }
  0x36   :  { %s1687_s10 = scalar_lea.hbm %s2007_s3, 16384 }
  0x37   :  { %p1688_p10 = scmp.ne.s32.totalorder %s2007_s3, %s1687_s10  ;;  %p1691_p11 = scmp.lt.u32.totalorder %s1687_s10, %s2007_s3 }
  0x39   :  { %p1693_p12 = pnand %p1691_p11, %p1688_p10 }
  0x3b   :  { %1696 = shalt.err (!%p1693_p12)
}
  0x3c   :  { %s1697_s15 = scalar_lea.vmem %s1806_s23, 16384  ;;  %p1702_p0 = scmp.lt.s32.totalorder %s1806_s23, %s1806_s23 }
  0x3d   :  { %p1698_p13 = scmp.ne.s32.totalorder %s1806_s23, %s1697_s15  ;;  %p1703_p1 = scmp.lt.s32.totalorder %s1697_s15, %s1697_s15 }
  0x3f   :  { %p1704_p2 = por %p1703_p1, %p1702_p0 }
  0x41   :  { %p1705_p3 = pnand %p1704_p2, %p1698_p13 }
  0x43   :  { %1708 = shalt.err (!%p1705_p3)
}
  0x44   :  { %59 = dma.hbm_to_vmem [thread:$0]  %s2007_s3, 16384, %s1806_s23, [#allocation9], %s1743_s1, %s1743_s1, %s1744_s17  }
  0x45   :  { %1731 = dma.done.wait [#allocation3], 256  }
  0x46   :  { %1732 = vsyncadd [#allocation3], 4294967040 }
  0x47   :  { %1733 = dma.done.wait [#allocation6], 16512  }
  0x48   :  { %1734 = vsyncadd [#allocation6], 4294950784 }
  0x49   :  { %1735 = dma.done.wait [#allocation9], 16384  }
  0x4a   :  { %1736 = vsyncadd [#allocation9], 4294950912  ;;  %v1747_v0 = vmov 0.0   ;;  %v77_v1 = vld [vmem:[#allocation5 + $0x8] sm:$0xff]  ;;  %v79_v3 = vld [vmem:[#allocation5 + $0x18] sm:$0xff] }
  0x4b   :  { %310 = vmatprep.mubr.f32.mxu0 %v1747_v0  ;;  %387 = vmatprep.mubr.f32.mxu1 %v1747_v0  ;;  %v85_v2 = vld [vmem:[#allocation5 + $0x48] sm:$0xff]  ;;  %v87_v5 = vld [vmem:[#allocation5 + $0x58] sm:$0xff]  ;;  %v76_v6 = vld [vmem:[#allocation5] sm:$0xff] }
  0x4c   :  { %v1291_v4 = vpack.c.bf16 %v85_v2, %v77_v1  ;;  %v84_v7 = vld [vmem:[#allocation5 + $0x40] sm:$0xff]  ;;  %v1323_v8 = vpack.c.bf16 %v87_v5, %v79_v3  ;;  %v78_v10 = vld [vmem:[#allocation5 + $0x10] sm:$0xff]  ;;  %v93_v12 = vld [vmem:[#allocation5 + $0x88] sm:$0xff] }
  0x4d   :  { %v1293_v9 = vpack.c.bf16 %v84_v7, %v76_v6  ;;  %v86_v11 = vld [vmem:[#allocation5 + $0x50] sm:$0xff]  ;;  %v101_v14 = vld [vmem:[#allocation5 + $0xc8] sm:$0xff]  ;;  %v95_v15 = vld [vmem:[#allocation5 + $0x98] sm:$0xff] }
  0x4e   :  { %1292 = vmatprep.subr.bf16.mxu0 %v1291_v4  ;;  %v1325_v13 = vpack.c.bf16 %v86_v11, %v78_v10  ;;  %v103_v16 = vld [vmem:[#allocation5 + $0xd8] sm:$0xff]  ;;  %1324 = vmatprep.subr.bf16.mxu1 %v1323_v8  ;;  %v1295_v17 = vpack.c.bf16 %v101_v14, %v93_v12  ;;  %v92_v19 = vld [vmem:[#allocation5 + $0x80] sm:$0xff]  ;;  %v94_v21 = vld [vmem:[#allocation5 + $0x90] sm:$0xff] }
  0x4f   :  { %1294 = vmatpush1.bf16.msra.mxu0 %v1293_v9  ;;  %v1327_v18 = vpack.c.bf16 %v103_v16, %v95_v15  ;;  %v100_v20 = vld [vmem:[#allocation5 + $0xc0] sm:$0xff]  ;;  %v102_v23 = vld [vmem:[#allocation5 + $0xd0] sm:$0xff]  ;;  %v109_v24 = vld [vmem:[#allocation5 + $0x108] sm:$0xff] }
  0x50   :  { %1326 = vmatpush1.bf16.msra.mxu1 %v1325_v13  ;;  %v1297_v22 = vpack.c.bf16 %v100_v20, %v92_v19  ;;  %v117_v25 = vld [vmem:[#allocation5 + $0x148] sm:$0xff]  ;;  %1296 = vmatprep.subr.bf16.mxu0 %v1295_v17  ;;  %v1329_v26 = vpack.c.bf16 %v102_v23, %v94_v21  ;;  %v111_v28 = vld [vmem:[#allocation5 + $0x118] sm:$0xff]  ;;  %v108_v30 = vld [vmem:[#allocation5 + $0x100] sm:$0xff] }
  0x51   :  { %1328 = vmatprep.subr.bf16.mxu1 %v1327_v18  ;;  %v1299_v27 = vpack.c.bf16 %v117_v25, %v109_v24  ;;  %v119_v29 = vld [vmem:[#allocation5 + $0x158] sm:$0xff]  ;;  %v116_v32 = vld [vmem:[#allocation5 + $0x140] sm:$0xff]  ;;  %v110_v33 = vld [vmem:[#allocation5 + $0x110] sm:$0xff] }
  0x52   :  { %v1331_v31 = vpack.c.bf16 %v119_v29, %v111_v28  ;;  %v118_v34 = vld [vmem:[#allocation5 + $0x150] sm:$0xff]  ;;  %v1301_v35 = vpack.c.bf16 %v116_v32, %v108_v30  ;;  %v125_v36 = vld [vmem:[#allocation5 + $0x188] sm:$0xff]  ;;  %v127_v38 = vld [vmem:[#allocation5 + $0x198] sm:$0xff] }
  0x53   :  { %1298 = vmatpush1.bf16.msra.mxu0 %v1297_v22  ;;  %v133_v37 = vld [vmem:[#allocation5 + $0x1c8] sm:$0xff]  ;;  %v1333_v39 = vpack.c.bf16 %v118_v34, %v110_v33  ;;  %v135_v41 = vld [vmem:[#allocation5 + $0x1d8] sm:$0xff]  ;;  %v124_v42 = vld [vmem:[#allocation5 + $0x180] sm:$0xff] }
  0x54   :  { %1330 = vmatpush1.bf16.msra.mxu1 %v1329_v26  ;;  %1300 = vmatprep.subr.bf16.mxu0 %v1299_v27  ;;  %v1303_v40 = vpack.c.bf16 %v133_v37, %v125_v36  ;;  %v132_v43 = vld [vmem:[#allocation5 + $0x1c0] sm:$0xff]  ;;  %v1335_v44 = vpack.c.bf16 %v135_v41, %v127_v38  ;;  %v126_v45 = vld [vmem:[#allocation5 + $0x190] sm:$0xff]  ;;  %v141_v47 = vld [vmem:[#allocation5 + $0x208] sm:$0xff] }
  0x55   :  { %1332 = vmatprep.subr.bf16.mxu1 %v1331_v31  ;;  %v134_v46 = vld [vmem:[#allocation5 + $0x1d0] sm:$0xff]  ;;  %v149_v48 = vld [vmem:[#allocation5 + $0x248] sm:$0xff]  ;;  %v143_v49 = vld [vmem:[#allocation5 + $0x218] sm:$0xff]  ;;  %v1305_v51 = vpack.c.bf16 %v132_v43, %v124_v42 }
  0x56   :  { %v151_v50 = vld [vmem:[#allocation5 + $0x258] sm:$0xff]  ;;  %v1337_v52 = vpack.c.bf16 %v134_v46, %v126_v45  ;;  %v1307_v53 = vpack.c.bf16 %v149_v48, %v141_v47  ;;  %v140_v54 = vld [vmem:[#allocation5 + $0x200] sm:$0xff]  ;;  %v142_v56 = vld [vmem:[#allocation5 + $0x210] sm:$0xff] }
  0x57   :  { %1302 = vmatpush1.bf16.msra.mxu0 %v1301_v35  ;;  %v148_v55 = vld [vmem:[#allocation5 + $0x240] sm:$0xff]  ;;  %v1339_v57 = vpack.c.bf16 %v151_v50, %v143_v49  ;;  %v150_v58 = vld [vmem:[#allocation5 + $0x250] sm:$0xff]  ;;  %v157_v59 = vld [vmem:[#allocation5 + $0x288] sm:$0xff] }
  0x58   :  { %1334 = vmatpush1.bf16.msra.mxu1 %v1333_v39  ;;  %1304 = vmatprep.subr.bf16.mxu0 %v1303_v40  ;;  %v165_v60 = vld [vmem:[#allocation5 + $0x2c8] sm:$0xff]  ;;  %v159_v61 = vld [vmem:[#allocation5 + $0x298] sm:$0xff]  ;;  %v1309_v63 = vpack.c.bf16 %v148_v55, %v140_v54  ;;  %v1341_v1 = vpack.c.bf16 %v150_v58, %v142_v56  ;;  %v156_v3 = vld [vmem:[#allocation5 + $0x280] sm:$0xff] }
  0x59   :  { %1336 = vmatprep.subr.bf16.mxu1 %v1335_v44  ;;  %v167_v62 = vld [vmem:[#allocation5 + $0x2d8] sm:$0xff]  ;;  %v1311_v2 = vpack.c.bf16 %v165_v60, %v157_v59  ;;  %v164_v4 = vld [vmem:[#allocation5 + $0x2c0] sm:$0xff]  ;;  %v158_v5 = vld [vmem:[#allocation5 + $0x290] sm:$0xff] }
  0x5a   :  { %v1343_v6 = vpack.c.bf16 %v167_v62, %v159_v61  ;;  %v166_v7 = vld [vmem:[#allocation5 + $0x2d0] sm:$0xff]  ;;  %v173_v8 = vld [vmem:[#allocation5 + $0x308] sm:$0xff]  ;;  %v175_v10 = vld [vmem:[#allocation5 + $0x318] sm:$0xff]  ;;  %v1313_v12 = vpack.c.bf16 %v164_v4, %v156_v3 }
  0x5b   :  { %1306 = vmatpush1.bf16.msra.mxu0 %v1305_v51  ;;  %v181_v9 = vld [vmem:[#allocation5 + $0x348] sm:$0xff]  ;;  %v183_v11 = vld [vmem:[#allocation5 + $0x358] sm:$0xff]  ;;  %v1345_v13 = vpack.c.bf16 %v166_v7, %v158_v5  ;;  %v172_v15 = vld [vmem:[#allocation5 + $0x300] sm:$0xff] }
  0x5c   :  { %1338 = vmatpush1.bf16.msra.mxu1 %v1337_v52  ;;  %1308 = vmatprep.subr.bf16.mxu0 %v1307_v53  ;;  %v1315_v14 = vpack.c.bf16 %v181_v9, %v173_v8  ;;  %v180_v16 = vld [vmem:[#allocation5 + $0x340] sm:$0xff]  ;;  %v174_v17 = vld [vmem:[#allocation5 + $0x310] sm:$0xff]  ;;  %v1347_v18 = vpack.c.bf16 %v183_v11, %v175_v10  ;;  %v189_v20 = vld [vmem:[#allocation5 + $0x388] sm:$0xff] }
  0x5d   :  { %1340 = vmatprep.subr.bf16.mxu1 %v1339_v57  ;;  %v182_v19 = vld [vmem:[#allocation5 + $0x350] sm:$0xff]  ;;  %v197_v21 = vld [vmem:[#allocation5 + $0x3c8] sm:$0xff]  ;;  %v191_v22 = vld [vmem:[#allocation5 + $0x398] sm:$0xff]  ;;  %v1317_v24 = vpack.c.bf16 %v180_v16, %v172_v15 }
  0x5e   :  { %v199_v23 = vld [vmem:[#allocation5 + $0x3d8] sm:$0xff]  ;;  %v1349_v25 = vpack.c.bf16 %v182_v19, %v174_v17  ;;  %v1319_v26 = vpack.c.bf16 %v197_v21, %v189_v20  ;;  %v188_v27 = vld [vmem:[#allocation5 + $0x380] sm:$0xff]  ;;  %v190_v29 = vld [vmem:[#allocation5 + $0x390] sm:$0xff] }
  0x5f   :  { %1310 = vmatpush1.bf16.msra.mxu0 %v1309_v63  ;;  %v196_v28 = vld [vmem:[#allocation5 + $0x3c0] sm:$0xff]  ;;  %v1351_v30 = vpack.c.bf16 %v199_v23, %v191_v22  ;;  %v198_v31 = vld [vmem:[#allocation5 + $0x3d0] sm:$0xff]  ;;  %v81_v32 = vld [vmem:[#allocation5 + $0x28] sm:$0xff] }
  0x60   :  { %1342 = vmatpush1.bf16.msra.mxu1 %v1341_v1  ;;  %1312 = vmatprep.subr.bf16.mxu0 %v1311_v2  ;;  %v89_v33 = vld [vmem:[#allocation5 + $0x68] sm:$0xff]  ;;  %v83_v34 = vld [vmem:[#allocation5 + $0x38] sm:$0xff]  ;;  %v1321_v36 = vpack.c.bf16 %v196_v28, %v188_v27  ;;  %v1353_v37 = vpack.c.bf16 %v198_v31, %v190_v29  ;;  %v80_v39 = vld [vmem:[#allocation5 + $0x20] sm:$0xff] }
  0x61   :  { %1344 = vmatprep.subr.bf16.mxu1 %v1343_v6  ;;  %v91_v35 = vld [vmem:[#allocation5 + $0x78] sm:$0xff]  ;;  %v1355_v38 = vpack.c.bf16 %v89_v33, %v81_v32  ;;  %v88_v40 = vld [vmem:[#allocation5 + $0x60] sm:$0xff]  ;;  %v82_v42 = vld [vmem:[#allocation5 + $0x30] sm:$0xff] }
  0x62   :  { %v1387_v41 = vpack.c.bf16 %v91_v35, %v83_v34  ;;  %v90_v43 = vld [vmem:[#allocation5 + $0x70] sm:$0xff]  ;;  %v97_v44 = vld [vmem:[#allocation5 + $0xa8] sm:$0xff]  ;;  %v1357_v47 = vpack.c.bf16 %v88_v40, %v80_v39  ;;  %v99_v48 = vld [vmem:[#allocation5 + $0xb8] sm:$0xff] }
  0x63   :  { %1314 = vmatpush1.bf16.msra.mxu0 %v1313_v12  ;;  %v105_v45 = vld [vmem:[#allocation5 + $0xe8] sm:$0xff]  ;;  %v1842_v46 = vld [vmem:[#allocation2] sm:$0xff]  ;;  %v107_v49 = vld [vmem:[#allocation5 + $0xf8] sm:$0xff]  ;;  %v1389_v50 = vpack.c.bf16 %v90_v43, %v82_v42 }
  0x64   :  { %1346 = vmatpush1.bf16.msra.mxu1 %v1345_v13  ;;  %1316 = vmatprep.subr.bf16.mxu0 %v1315_v14  ;;  %v96_v51 = vld [vmem:[#allocation5 + $0xa0] sm:$0xff]  ;;  %v98_v53 = vld [vmem:[#allocation5 + $0xb0] sm:$0xff]  ;;  %v1359_v54 = vpack.c.bf16 %v105_v45, %v97_v44  ;;  %v113_v56 = vld [vmem:[#allocation5 + $0x128] sm:$0xff]  ;;  %v1391_v58 = vpack.c.bf16 %v107_v49, %v99_v48 }
  0x65   :  { %1348 = vmatprep.subr.bf16.mxu1 %v1347_v18  ;;  %v104_v52 = vld [vmem:[#allocation5 + $0xe0] sm:$0xff]  ;;  %v106_v55 = vld [vmem:[#allocation5 + $0xf0] sm:$0xff]  ;;  %v121_v57 = vld [vmem:[#allocation5 + $0x168] sm:$0xff] }
  0x66   :  { %v115_v59 = vld [vmem:[#allocation5 + $0x138] sm:$0xff]  ;;  %v1361_v62 = vpack.c.bf16 %v104_v52, %v96_v51  ;;  %v1393_v63 = vpack.c.bf16 %v106_v55, %v98_v53  ;;  %v1363_v1 = vpack.c.bf16 %v121_v57, %v113_v56  ;;  %v112_v2 = vld [vmem:[#allocation5 + $0x120] sm:$0xff]  ;;  %v114_v4 = vld [vmem:[#allocation5 + $0x130] sm:$0xff] }
  0x67   :  { %1318 = vmatpush1.bf16.msra.mxu0 %v1317_v24  ;;  %v123_v60 = vld [vmem:[#allocation5 + $0x178] sm:$0xff]  ;;  %v120_v3 = vld [vmem:[#allocation5 + $0x160] sm:$0xff]  ;;  %v122_v6 = vld [vmem:[#allocation5 + $0x170] sm:$0xff] }
  0x68   :  { %1350 = vmatpush1.bf16.msra.mxu1 %v1349_v25  ;;  %1320 = vmatprep.subr.bf16.mxu0 %v1319_v26  ;;  %v1846_v61 = vld [vmem:[#allocation2 + $0x8] sm:$0xff]  ;;  %v1395_v5 = vpack.c.bf16 %v123_v60, %v115_v59  ;;  %v129_v7 = vld [vmem:[#allocation5 + $0x1a8] sm:$0xff]  ;;  %v1365_v11 = vpack.c.bf16 %v120_v3, %v112_v2  ;;  %v1397_v12 = vpack.c.bf16 %v122_v6, %v114_v4  ;;  %v128_v14 = vld [vmem:[#allocation5 + $0x1a0] sm:$0xff] }
  0x69   :  { %1352 = vmatprep.subr.bf16.mxu1 %v1351_v30  ;;  %v137_v8 = vld [vmem:[#allocation5 + $0x1e8] sm:$0xff]  ;;  %v131_v9 = vld [vmem:[#allocation5 + $0x1b8] sm:$0xff]  ;;  %v136_v15 = vld [vmem:[#allocation5 + $0x1e0] sm:$0xff] }
  0x6a   :  { %v139_v10 = vld [vmem:[#allocation5 + $0x1f8] sm:$0xff]  ;;  %v1367_v13 = vpack.c.bf16 %v137_v8, %v129_v7  ;;  %v130_v16 = vld [vmem:[#allocation5 + $0x1b0] sm:$0xff]  ;;  %v145_v19 = vld [vmem:[#allocation5 + $0x228] sm:$0xff]  ;;  %v1369_v23 = vpack.c.bf16 %v136_v15, %v128_v14 }
  0x6b   :  { %1322 = vmatpush1.bf16.msra.mxu0 %v1321_v36  ;;  %v1399_v17 = vpack.c.bf16 %v139_v10, %v131_v9  ;;  %v138_v18 = vld [vmem:[#allocation5 + $0x1f0] sm:$0xff]  ;;  %v153_v20 = vld [vmem:[#allocation5 + $0x268] sm:$0xff]  ;;  %v147_v21 = vld [vmem:[#allocation5 + $0x238] sm:$0xff] }
  0x6c   :  { %1354 = vmatpush1.bf16.msra.mxu1 %v1353_v37  ;;  %1356 = vmatprep.subr.bf16.mxu0 %v1355_v38  ;;  %v155_v22 = vld [vmem:[#allocation5 + $0x278] sm:$0xff]  ;;  %v1401_v24 = vpack.c.bf16 %v138_v18, %v130_v16  ;;  %v1371_v25 = vpack.c.bf16 %v153_v20, %v145_v19  ;;  %v144_v26 = vld [vmem:[#allocation5 + $0x220] sm:$0xff]  ;;  %v146_v28 = vld [vmem:[#allocation5 + $0x230] sm:$0xff] }
  0x6d   :  { %1388 = vmatprep.subr.bf16.mxu1 %v1387_v41  ;;  %v152_v27 = vld [vmem:[#allocation5 + $0x260] sm:$0xff]  ;;  %v1403_v29 = vpack.c.bf16 %v155_v22, %v147_v21  ;;  %v154_v30 = vld [vmem:[#allocation5 + $0x270] sm:$0xff]  ;;  %v161_v31 = vld [vmem:[#allocation5 + $0x2a8] sm:$0xff] }
  0x6e   :  { %311 = vmatmul.mubr.f32.vlgmr.msra.gmra.mrb[0].mxu0 %v1842_v46  ;;  %v169_v32 = vld [vmem:[#allocation5 + $0x2e8] sm:$0xff]  ;;  %v163_v33 = vld [vmem:[#allocation5 + $0x2b8] sm:$0xff]  ;;  %v1373_v35 = vpack.c.bf16 %v152_v27, %v144_v26  ;;  %v1405_v36 = vpack.c.bf16 %v154_v30, %v146_v28  ;;  %v160_v38 = vld [vmem:[#allocation5 + $0x2a0] sm:$0xff] }
  0x6f   :  { %388 = vmatmul.mubr.f32.vlgmr.msra.gmra.mrb[0].mxu1 %v1842_v46  ;;  %1358 = vmatpush1.bf16.msra.mxu0 %v1357_v47  ;;  %v171_v34 = vld [vmem:[#allocation5 + $0x2f8] sm:$0xff]  ;;  %v1375_v37 = vpack.c.bf16 %v169_v32, %v161_v31  ;;  %v168_v39 = vld [vmem:[#allocation5 + $0x2e0] sm:$0xff]  ;;  %v162_v40 = vld [vmem:[#allocation5 + $0x2b0] sm:$0xff] }
  0x70   :  { %1390 = vmatpush1.bf16.msra.mxu1 %v1389_v50  ;;  %316 = vmatprep.mubr.f32.mxu0 %v1747_v0  ;;  %v1407_v41 = vpack.c.bf16 %v171_v34, %v163_v33  ;;  %v170_v42 = vld [vmem:[#allocation5 + $0x2f0] sm:$0xff]  ;;  %v177_v43 = vld [vmem:[#allocation5 + $0x328] sm:$0xff]  ;;  %v179_v45 = vld [vmem:[#allocation5 + $0x338] sm:$0xff]  ;;  %v1377_v48 = vpack.c.bf16 %v168_v39, %v160_v38 }
  0x71   :  { %393 = vmatprep.mubr.f32.mxu1 %v1747_v0  ;;  %1360 = vmatprep.subr.bf16.mxu0 %v1359_v54  ;;  %v185_v44 = vld [vmem:[#allocation5 + $0x368] sm:$0xff]  ;;  %v187_v47 = vld [vmem:[#allocation5 + $0x378] sm:$0xff]  ;;  %v1409_v49 = vpack.c.bf16 %v170_v42, %v162_v40  ;;  %v176_v51 = vld [vmem:[#allocation5 + $0x320] sm:$0xff] }
  0x72   :  { %317 = vmatmul.mubr.f32.gmra.mrb[2].mxu0 %v1846_v61  ;;  %1392 = vmatprep.subr.bf16.mxu1 %v1391_v58  ;;  %v1379_v50 = vpack.c.bf16 %v185_v44, %v177_v43  ;;  %v184_v52 = vld [vmem:[#allocation5 + $0x360] sm:$0xff]  ;;  %v178_v53 = vld [vmem:[#allocation5 + $0x330] sm:$0xff]  ;;  %v1411_v54 = vpack.c.bf16 %v187_v47, %v179_v45  ;;  %v193_v56 = vld [vmem:[#allocation5 + $0x3a8] sm:$0xff] }
  0x73   :  { %394 = vmatmul.mubr.f32.gmra.mrb[2].mxu1 %v1846_v61  ;;  %1362 = vmatpush1.bf16.msra.mxu0 %v1361_v62  ;;  %v186_v55 = vld [vmem:[#allocation5 + $0x370] sm:$0xff]  ;;  %v201_v57 = vld [vmem:[#allocation5 + $0x3e8] sm:$0xff]  ;;  %v195_v58 = vld [vmem:[#allocation5 + $0x3b8] sm:$0xff]  ;;  %v1381_v60 = vpack.c.bf16 %v184_v52, %v176_v51 }
  0x74   :  { %1394 = vmatpush1.bf16.msra.mxu1 %v1393_v63  ;;  %1364 = vmatprep.subr.bf16.mxu0 %v1363_v1  ;;  %v203_v59 = vld [vmem:[#allocation5 + $0x3f8] sm:$0xff]  ;;  %v1413_v62 = vpack.c.bf16 %v186_v55, %v178_v53  ;;  %v1383_v63 = vpack.c.bf16 %v201_v57, %v193_v56  ;;  %v192_v1 = vld [vmem:[#allocation5 + $0x3a0] sm:$0xff]  ;;  %v194_v4 = vld [vmem:[#allocation5 + $0x3b0] sm:$0xff] }
  0x75   :  { %1396 = vmatprep.subr.bf16.mxu1 %v1395_v5  ;;  %464 = vmatprep.mubr.f32.mxu0 %v1747_v0  ;;  %v200_v2 = vld [vmem:[#allocation5 + $0x3e0] sm:$0xff]  ;;  %v1415_v3 = vpack.c.bf16 %v203_v59, %v195_v58  ;;  %v202_v5 = vld [vmem:[#allocation5 + $0x3f0] sm:$0xff]  ;;  %v682_v8 = vld [vmem:[#allocation8 + $0x80] sm:$0xff] }
  0x76   :  { %541 = vmatprep.mubr.f32.mxu1 %v1747_v0  ;;  %v1385_v6 = vpack.c.bf16 %v200_v2, %v192_v1  ;;  %v1417_v7 = vpack.c.bf16 %v202_v5, %v194_v4  ;;  %v683_v9 = vld [vmem:[#allocation8 + $0x88] sm:$0xff]  ;;  %v714_v10 = vld [vmem:[#allocation8 + $0x180] sm:$0xff]  ;;  %v685_v19 = vld [vmem:[#allocation8 + $0x98] sm:$0xff] }
  0x77   :  { %1366 = vmatpush1.bf16.msra.mxu0 %v1365_v11  ;;  %v1419_v11 = vpack.c.bf16 %v683_v9, %v682_v8  ;;  %v667_v14 = vld [vmem:[#allocation8 + $0x8] sm:$0xff]  ;;  %v716_v20 = vld [vmem:[#allocation8 + $0x190] sm:$0xff]  ;;  %v717_v21 = vld [vmem:[#allocation8 + $0x198] sm:$0xff] }
  0x78   :  { %1398 = vmatpush1.bf16.msra.mxu1 %v1397_v12  ;;  %1368 = vmatprep.subr.bf16.mxu0 %v1367_v13  ;;  %v715_v12 = vld [vmem:[#allocation8 + $0x188] sm:$0xff]  ;;  %v666_v13 = vld [vmem:[#allocation8] sm:$0xff]  ;;  %v668_v22 = vld [vmem:[#allocation8 + $0x10] sm:$0xff] }
  0x79   :  { %1400 = vmatprep.subr.bf16.mxu1 %v1399_v17  ;;  %v1451_v15 = vpack.c.bf16 %v715_v12, %v714_v10  ;;  %v1421_v16 = vpack.c.bf16 %v667_v14, %v666_v13  ;;  %v698_v17 = vld [vmem:[#allocation8 + $0x100] sm:$0xff]  ;;  %v699_v18 = vld [vmem:[#allocation8 + $0x108] sm:$0xff]  ;;  %v700_v26 = vld [vmem:[#allocation8 + $0x110] sm:$0xff] }
  0x7a   :  { %v701_v27 = vld [vmem:[#allocation8 + $0x118] sm:$0xff]  ;;  %v687_v30 = vld [vmem:[#allocation8 + $0xa8] sm:$0xff]  ;;  %v718_v31 = vld [vmem:[#allocation8 + $0x1a0] sm:$0xff] }
  0x7b   :  { %1370 = vmatpush1.bf16.msra.mxu0 %v1369_v23  ;;  %v669_v23 = vld [vmem:[#allocation8 + $0x18] sm:$0xff]  ;;  %v1457_v28 = vpack.c.bf16 %v701_v27, %v700_v26  ;;  %v719_v33 = vld [vmem:[#allocation8 + $0x1a8] sm:$0xff]  ;;  %v670_v34 = vld [vmem:[#allocation8 + $0x20] sm:$0xff] }
  0x7c   :  { %1402 = vmatpush1.bf16.msra.mxu1 %v1401_v24  ;;  %1372 = vmatprep.subr.bf16.mxu0 %v1371_v25  ;;  %v1455_v24 = vpack.c.bf16 %v717_v21, %v716_v20  ;;  %v1425_v25 = vpack.c.bf16 %v669_v23, %v668_v22  ;;  %v702_v38 = vld [vmem:[#allocation8 + $0x120] sm:$0xff]  ;;  %v703_v39 = vld [vmem:[#allocation8 + $0x128] sm:$0xff]  ;;  %v689_v42 = vld [vmem:[#allocation8 + $0xb8] sm:$0xff] }
  0x7d   :  { %1404 = vmatprep.subr.bf16.mxu1 %v1403_v29  ;;  %v686_v29 = vld [vmem:[#allocation8 + $0xa0] sm:$0xff]  ;;  %v1461_v40 = vpack.c.bf16 %v703_v39, %v702_v38  ;;  %v720_v43 = vld [vmem:[#allocation8 + $0x1b0] sm:$0xff]  ;;  %v721_v45 = vld [vmem:[#allocation8 + $0x1b8] sm:$0xff] }
  0x7e   :  { %v1427_v32 = vpack.c.bf16 %v687_v30, %v686_v29  ;;  %v672_v47 = vld [vmem:[#allocation8 + $0x30] sm:$0xff]  ;;  %v705_v52 = vld [vmem:[#allocation8 + $0x138] sm:$0xff]  ;;  %v691_v55 = vld [vmem:[#allocation8 + $0xc8] sm:$0xff] }
  0x7f   :  { %1374 = vmatpush1.bf16.msra.mxu0 %v1373_v35  ;;  %v671_v35 = vld [vmem:[#allocation8 + $0x28] sm:$0xff]  ;;  %v704_v51 = vld [vmem:[#allocation8 + $0x130] sm:$0xff]  ;;  %v722_v56 = vld [vmem:[#allocation8 + $0x1c0] sm:$0xff] }
  0x80   :  { %1406 = vmatpush1.bf16.msra.mxu1 %v1405_v36  ;;  %1376 = vmatprep.subr.bf16.mxu0 %v1375_v37  ;;  %v1459_v36 = vpack.c.bf16 %v719_v33, %v718_v31  ;;  %v1429_v37 = vpack.c.bf16 %v671_v35, %v670_v34  ;;  %v1465_v53 = vpack.c.bf16 %v705_v52, %v704_v51  ;;  %v723_v58 = vld [vmem:[#allocation8 + $0x1c8] sm:$0xff]  ;;  %v674_v59 = vld [vmem:[#allocation8 + $0x40] sm:$0xff]  ;;  %v692_v4 = vld [vmem:[#allocation8 + $0xd0] sm:$0xff] }
  0x81   :  { %1408 = vmatprep.subr.bf16.mxu1 %v1407_v41  ;;  %v688_v41 = vld [vmem:[#allocation8 + $0xb0] sm:$0xff]  ;;  %v706_v1 = vld [vmem:[#allocation8 + $0x140] sm:$0xff]  ;;  %v707_v2 = vld [vmem:[#allocation8 + $0x148] sm:$0xff] }
  0x82   :  { %v1431_v44 = vpack.c.bf16 %v689_v42, %v688_v41  ;;  %v693_v5 = vld [vmem:[#allocation8 + $0xd8] sm:$0xff]  ;;  %v676_v9 = vld [vmem:[#allocation8 + $0x50] sm:$0xff]  ;;  %v679_v20 = vld [vmem:[#allocation8 + $0x68] sm:$0xff] }
  0x83   :  { %1378 = vmatpush1.bf16.msra.mxu0 %v1377_v48  ;;  %v673_v48 = vld [vmem:[#allocation8 + $0x38] sm:$0xff]  ;;  %v708_v13 = vld [vmem:[#allocation8 + $0x150] sm:$0xff]  ;;  %v710_v22 = vld [vmem:[#allocation8 + $0x160] sm:$0xff] }
  0x84   :  { %1410 = vmatpush1.bf16.msra.mxu1 %v1409_v49  ;;  %1380 = vmatprep.subr.bf16.mxu0 %v1379_v50  ;;  %v1463_v49 = vpack.c.bf16 %v721_v45, %v720_v43  ;;  %v1433_v50 = vpack.c.bf16 %v673_v48, %v672_v47  ;;  %v725_v8 = vld [vmem:[#allocation8 + $0x1d8] sm:$0xff]  ;;  %v711_v23 = vld [vmem:[#allocation8 + $0x168] sm:$0xff]  ;;  %v728_v27 = vld [vmem:[#allocation8 + $0x1f0] sm:$0xff]  ;;  %v206_v43 = vlaneseq }
  0x85   :  { %1412 = vmatprep.subr.bf16.mxu1 %v1411_v54  ;;  %v690_v54 = vld [vmem:[#allocation8 + $0xc0] sm:$0xff]  ;;  %v677_v10 = vld [vmem:[#allocation8 + $0x58] sm:$0xff]  ;;  %v680_v30 = vld [vmem:[#allocation8 + $0x70] sm:$0xff] }
  0x86   :  { %v1435_v57 = vpack.c.bf16 %v691_v55, %v690_v54  ;;  %v1441_v12 = vpack.c.bf16 %v677_v10, %v676_v9  ;;  %v709_v14 = vld [vmem:[#allocation8 + $0x158] sm:$0xff]  ;;  %v712_v34 = vld [vmem:[#allocation8 + $0x170] sm:$0xff]  ;;  %v747_v38 = vld [vmem:[#allocation8 + $0x288] sm:$0xff] }
  0x87   :  { %1382 = vmatpush1.bf16.msra.mxu0 %v1381_v60  ;;  %v675_v60 = vld [vmem:[#allocation8 + $0x48] sm:$0xff]  ;;  %v697_v26 = vld [vmem:[#allocation8 + $0xf8] sm:$0xff]  ;;  %v778_v39 = vld [vmem:[#allocation8 + $0x380] sm:$0xff] }
  0x88   :  { %1414 = vmatpush1.bf16.msra.mxu1 %v1413_v62  ;;  %1384 = vmatprep.subr.bf16.mxu0 %v1383_v63  ;;  %v1467_v62 = vpack.c.bf16 %v723_v58, %v722_v56  ;;  %v1437_v63 = vpack.c.bf16 %v675_v60, %v674_v59  ;;  %v729_v29 = vld [vmem:[#allocation8 + $0x1f8] sm:$0xff]  ;;  %v779_v41 = vld [vmem:[#allocation8 + $0x388] sm:$0xff] }
  0x89   :  { %1416 = vmatprep.subr.bf16.mxu1 %v1415_v3  ;;  %v1469_v3 = vpack.c.bf16 %v707_v2, %v706_v1  ;;  %v681_v31 = vld [vmem:[#allocation8 + $0x78] sm:$0xff]  ;;  %v1515_v42 = vpack.c.bf16 %v779_v41, %v778_v39  ;;  %v748_v39 = vld [vmem:[#allocation8 + $0x290] sm:$0xff] }
  0x8a   :  { %v1449_v33 = vpack.c.bf16 %v681_v31, %v680_v30  ;;  %v713_v35 = vld [vmem:[#allocation8 + $0x178] sm:$0xff] }
  0x8b   :  { %1386 = vmatpush1.bf16.msra.mxu0 %v1385_v6  ;;  %v724_v6 = vld [vmem:[#allocation8 + $0x1d0] sm:$0xff]  ;;  %v1863_v47 = vld [vmem:[#allocation7] sm:$0xff] }
  0x8c   :  { %1418 = vmatpush1.bf16.msra.mxu1 %v1417_v7  ;;  %1420 = vmatprep.subr.bf16.mxu0 %v1419_v11  ;;  %v1439_v7 = vpack.c.bf16 %v693_v5, %v692_v4  ;;  %v1471_v11 = vpack.c.bf16 %v725_v8, %v724_v6 }
  0x8d   :  { %1452 = vmatprep.subr.bf16.mxu1 %v1451_v15  ;;  %v1473_v15 = vpack.c.bf16 %v709_v14, %v708_v13 }
  0x8e   :  { %465 = vmatmul.mubr.f32.vlgmr.msra.gmra.mrb[4].mxu0 %v1842_v46 }
  0x8f   :  { %542 = vmatmul.mubr.f32.vlgmr.msra.gmra.mrb[4].mxu1 %v1842_v46  ;;  %470 = vmatprep.mubr.f32.mxu0 %v1747_v0  ;;  %v1453_v46 = vpack.c.bf16 %v699_v18, %v698_v17  ;;  %v695_v17 = vld [vmem:[#allocation8 + $0xe8] sm:$0xff]  ;;  %v726_v18 = vld [vmem:[#allocation8 + $0x1e0] sm:$0xff] }
  0x90   :  { %547 = vmatprep.mubr.f32.mxu1 %v1747_v0  ;;  %1422 = vmatpush3.bf16.msra.mxu0 %v1421_v16  ;;  %v684_v0 = vld [vmem:[#allocation8 + $0x90] sm:$0xff]  ;;  %v694_v16 = vld [vmem:[#allocation8 + $0xe0] sm:$0xff] }
  0x91   :  { %1454 = vmatpush3.bf16.msra.mxu1 %v1453_v46  ;;  %v1443_v46 = vpack.c.bf16 %v695_v17, %v694_v16 }
  0x92   :  { %471 = vmatmul.mubr.f32.gmra.mrb[6].mxu0 %v1846_v61  ;;  %1456 = vmatprep.subr.bf16.mxu1 %v1455_v24  ;;  %v1477_v24 = vpack.c.bf16 %v711_v23, %v710_v22 }
  0x93   :  { %548 = vmatmul.mubr.f32.gmra.mrb[6].mxu1 %v1846_v61  ;;  %v1423_v61 = vpack.c.bf16 %v685_v19, %v684_v0  ;;  %v727_v0 = vld [vmem:[#allocation8 + $0x1e8] sm:$0xff]  ;;  %v678_v19 = vld [vmem:[#allocation8 + $0x60] sm:$0xff] }
  0x94   :  { %v1445_v21 = vpack.c.bf16 %v679_v20, %v678_v19 }
  0x95   :  { %1424 = vmatprep.subr.bf16.mxu0 %v1423_v61  ;;  %1458 = vmatpush3.bf16.msra.mxu1 %v1457_v28  ;;  %v1475_v61 = vpack.c.bf16 %v727_v0, %v726_v18 }
  0x96   :  { %1426 = vmatpush3.bf16.msra.mxu0 %v1425_v25  ;;  %1460 = vmatprep.subr.bf16.mxu1 %v1459_v36  ;;  %v696_v25 = vld [vmem:[#allocation8 + $0xf0] sm:$0xff]  ;;  %v1481_v36 = vpack.c.bf16 %v713_v35, %v712_v34  ;;  %v730_v34 = vld [vmem:[#allocation8 + $0x200] sm:$0xff]  ;;  %v731_v35 = vld [vmem:[#allocation8 + $0x208] sm:$0xff] }
  0x97   :  { %1428 = vmatprep.subr.bf16.mxu0 %v1427_v32  ;;  %v1447_v28 = vpack.c.bf16 %v697_v26, %v696_v25  ;;  %v1479_v32 = vpack.c.bf16 %v729_v29, %v728_v27 }
  0x99   :  { %1462 = vmatpush3.bf16.msra.mxu1 %v1461_v40 }
  0x9a   :  { %1430 = vmatpush3.bf16.msra.mxu0 %v1429_v37  ;;  %1464 = vmatprep.subr.bf16.mxu1 %v1463_v49  ;;  %v746_v37 = vld [vmem:[#allocation8 + $0x280] sm:$0xff] }
  0x9b   :  { %1432 = vmatprep.subr.bf16.mxu0 %v1431_v44  ;;  %v1483_v40 = vpack.c.bf16 %v747_v38, %v746_v37  ;;  %v1860_v44 = vshrl.u32 %v206_v43, 7  ;;  %v763_v38 = vld [vmem:[#allocation8 + $0x308] sm:$0xff]  ;;  %v1901_v43 = vld [vmem:[#allocation8 + $0x390] sm:$0xff] }
  0x9d   :  { %1466 = vmatpush3.bf16.msra.mxu1 %v1465_v53  ;;  %v208_v45 = vsub.s32 0, %v1860_v44  ;;  %v216_v48 = vsub.s32 2, %v1860_v44  ;;  %v212_v49 = vsub.s32 1, %v1860_v44  ;;  %v224_v30 = vsub.s32 4, %v1860_v44 }
  0x9e   :  { %1434 = vmatpush3.bf16.msra.mxu0 %v1433_v50  ;;  %1468 = vmatprep.subr.bf16.mxu1 %v1467_v62  ;;  %v220_v50 = vsub.s32 3, %v1860_v44  ;;  %v232_v31 = vsub.s32 6, %v1860_v44 }
  0x9f   :  { %1436 = vmatprep.subr.bf16.mxu0 %v1435_v57  ;;  %v209_v51 = vrot.slane %v1863_v47, %v208_v45  ;;  %v217_v52 = vrot.slane %v1863_v47, %v216_v48  ;;  %v213_v53 = vrot.slane %v1863_v47, %v212_v49  ;;  %v1903_v45 = vld [vmem:[#allocation8 + $0x398] sm:$0xff]  ;;  %v1905_v48 = vld [vmem:[#allocation8 + $0x210] sm:$0xff] }
  0xa0   :  { %v221_v54 = vrot.slane %v1863_v47, %v220_v50  ;;  %v1908_v50 = vrot.slane %v1863_v47, %v232_v31  ;;  %v767_v31 = vld [vmem:[#allocation8 + $0x328] sm:$0xff] }
  0xa1   :  { %1470 = vmatpush3.bf16.msra.mxu1 %v1469_v3 }
  0xa2   :  { %1438 = vmatpush3.bf16.msra.mxu0 %v1437_v63  ;;  %1472 = vmatprep.subr.bf16.mxu1 %v1471_v11 }
  0xa3   :  { %1440 = vmatprep.subr.bf16.mxu0 %v1439_v7 }
  0xa5   :  { %1474 = vmatpush3.bf16.msra.mxu1 %v1473_v15 }
  0xa6   :  { %1442 = vmatpush3.bf16.msra.mxu0 %v1441_v12  ;;  %1476 = vmatprep.subr.bf16.mxu1 %v1475_v61 }
  0xa7   :  { %1444 = vmatprep.subr.bf16.mxu0 %v1443_v46 }
  0xa9   :  { %1478 = vmatpush3.bf16.msra.mxu1 %v1477_v24 }
  0xaa   :  { %1446 = vmatpush3.bf16.msra.mxu0 %v1445_v21  ;;  %1480 = vmatprep.subr.bf16.mxu1 %v1479_v32  ;;  %v228_v32 = vsub.s32 5, %v1860_v44 }
  0xab   :  { %1448 = vmatprep.subr.bf16.mxu0 %v1447_v28 }
  0xad   :  { %1482 = vmatpush3.bf16.msra.mxu1 %v1481_v36  ;;  %v762_v36 = vld [vmem:[#allocation8 + $0x300] sm:$0xff] }
  0xae   :  { %1450 = vmatpush3.bf16.msra.mxu0 %v1449_v33  ;;  %1516 = vmatprep.subr.bf16.mxu1 %v1515_v42  ;;  %v236_v33 = vsub.s32 7, %v1860_v44  ;;  %v225_v42 = vrot.slane %v1863_v47, %v224_v30  ;;  %v1911_v44 = vrot.slane %v1863_v47, %v228_v32 }
  0xaf   :  { %1484 = vmatprep.subr.bf16.mxu0 %v1483_v40  ;;  %v749_v40 = vld [vmem:[#allocation8 + $0x298] sm:$0xff] }
 0x141   :  { %v312_v55 = vpop.f32.mrb[0].mxu0 }
 0x142   :  { %v1872_v56 = vadd.f32 %v312_v55, %v209_v51  ;;  %v389_v57 = vpop.f32.mrb[0].mxu1  ;;  %v314_v58 = vpop.f32.mrb[1].mxu0 }
 0x143   :  { %v1874_v59 = vadd.f32 %v389_v57, %v217_v52  ;;  %v1876_v60 = vadd.f32 %v314_v58, %v213_v53  ;;  %v391_v62 = vpop.f32.mrb[1].mxu1  ;;  %v1921_v57 = vrot.slane %v1863_v47, %v236_v33  ;;  %v1485_v58 = vpack.c.bf16 %v731_v35, %v730_v34  ;;  %v1933_v47 = vld [vmem:[#allocation8 + $0x3a8] sm:$0xff] }
 0x144   :  { %v1122_v63 = vmul.f32 -1.442695, %v1872_v56  ;;  %v1879_v1 = vadd.f32 %v391_v62, %v221_v54  ;;  %v1517_v62 = vpack.c.bf16 %v763_v38, %v762_v36  ;;  %v753_v36 = vld [vmem:[#allocation8 + $0x2b8] sm:$0xff] }
 0x145   :  { %v1124_v2 = vmul.f32 -1.442695, %v1874_v59  ;;  %v1123_v3 = vmul.f32 -1.442695, %v1876_v60  ;;  %v318_v4 = vpop.f32.mrb[2].mxu0 }
 0x146   :  { %1557 = vpow2.f32 %v1122_v63  ;;  %v1125_v5 = vmul.f32 -1.442695, %v1879_v1  ;;  %v1884_v6 = vadd.f32 %v318_v4, %v209_v51  ;;  %v395_v7 = vpop.f32.mrb[2].mxu1  ;;  %v320_v8 = vpop.f32.mrb[3].mxu0  ;;  %v1913_v51 = vld [vmem:[#allocation8 + $0x218] sm:$0xff]  ;;  %v1923_v63 = vld [vmem:[#allocation8 + $0x2a0] sm:$0xff] }
 0x147   :  { %1559 = vpow2.f32 %v1124_v2  ;;  %v1886_v9 = vadd.f32 %v395_v7, %v217_v52  ;;  %v1888_v10 = vadd.f32 %v320_v8, %v213_v53  ;;  %v397_v11 = vpop.f32.mrb[3].mxu1  ;;  %v1915_v52 = vld [vmem:[#allocation8 + $0x310] sm:$0xff]  ;;  %v1917_v53 = vld [vmem:[#allocation8 + $0x318] sm:$0xff]  ;;  %v1925_v2 = vld [vmem:[#allocation8 + $0x2a8] sm:$0xff]  ;;  %v1487_v8 = vpack.c.bf16 %v749_v40, %v748_v39 }
 0x148   :  { %1561 = vpow2.f32 %v1123_v3  ;;  %v1130_v12 = vmul.f32 -1.442695, %v1884_v6  ;;  %v1891_v13 = vadd.f32 %v397_v11, %v221_v54  ;;  %v1519_v11 = vpack.c.bf16 %v1903_v45, %v1901_v43  ;;  %v784_v40 = vld [vmem:[#allocation8 + $0x3b0] sm:$0xff] }
 0x149   :  { %1563 = vpow2.f32 %v1125_v5  ;;  %v1132_v14 = vmul.f32 -1.442695, %v1886_v9  ;;  %v1131_v15 = vmul.f32 -1.442695, %v1888_v10 }
 0x14a   :  { %1565 = vpow2.f32 %v1130_v12  ;;  %v1133_v16 = vmul.f32 -1.442695, %v1891_v13 }
 0x14b   :  { %1567 = vpow2.f32 %v1132_v14 }
 0x14c   :  { %1569 = vpow2.f32 %v1131_v15 }
 0x14d   :  { %1571 = vpow2.f32 %v1133_v16 }
 0x150   :  { %v1558_v17 = vpop.eup %1557 }
 0x151   :  { %v1560_v18 = vpop.eup %1559  ;;  %v602_v46 = vadd.f32 1.0, %v1558_v17 }
 0x152   :  { %v1562_v0 = vpop.eup %1561  ;;  %v604_v19 = vadd.f32 1.0, %v1560_v18 }
 0x153   :  { %v1564_v20 = vpop.eup %1563  ;;  %1573 = vrcp.f32 %v602_v46  ;;  %v603_v61 = vadd.f32 1.0, %v1562_v0 }
 0x154   :  { %v1566_v21 = vpop.eup %1565  ;;  %1575 = vrcp.f32 %v604_v19  ;;  %v605_v22 = vadd.f32 1.0, %v1564_v20  ;;  %v1491_v19 = vpack.c.bf16 %v1925_v2, %v1923_v63  ;;  %v787_v63 = vld [vmem:[#allocation8 + $0x3c8] sm:$0xff] }
 0x155   :  { %v1568_v23 = vpop.eup %1567  ;;  %1577 = vrcp.f32 %v603_v61  ;;  %v610_v24 = vadd.f32 1.0, %v1566_v21 }
 0x156   :  { %v1570_v25 = vpop.eup %1569  ;;  %1579 = vrcp.f32 %v605_v22  ;;  %v612_v26 = vadd.f32 1.0, %v1568_v23 }
 0x157   :  { %v1572_v27 = vpop.eup %1571  ;;  %1581 = vrcp.f32 %v610_v24  ;;  %v611_v28 = vadd.f32 1.0, %v1570_v25  ;;  %v734_v24 = vld [vmem:[#allocation8 + $0x220] sm:$0xff]  ;;  %v735_v25 = vld [vmem:[#allocation8 + $0x228] sm:$0xff] }
 0x158   :  { %1583 = vrcp.f32 %v612_v26  ;;  %v613_v29 = vadd.f32 1.0, %v1572_v27  ;;  %v766_v26 = vld [vmem:[#allocation8 + $0x320] sm:$0xff]  ;;  %v1493_v39 = vpack.c.bf16 %v735_v25, %v734_v24 }
 0x159   :  { %1585 = vrcp.f32 %v611_v28  ;;  %v1525_v45 = vpack.c.bf16 %v767_v31, %v766_v26  ;;  %v773_v26 = vld [vmem:[#allocation8 + $0x358] sm:$0xff]  ;;  %v791_v31 = vld [vmem:[#allocation8 + $0x3e8] sm:$0xff] }
 0x15a   :  { %1587 = vrcp.f32 %v613_v29 }
 0x15d   :  { %v1574_v37 = vpop.eup %1573 }
 0x15e   :  { %v1576_v41 = vpop.eup %1575  ;;  %v650_v4 = vmul.f32 %v1574_v37, %v1872_v56  ;;  %v1489_v56 = vpack.c.bf16 %v1913_v51, %v1905_v48  ;;  %v736_v48 = vld [vmem:[#allocation8 + $0x230] sm:$0xff]  ;;  %v737_v51 = vld [vmem:[#allocation8 + $0x238] sm:$0xff] }
 0x15f   :  { %v1578_v49 = vpop.eup %1577  ;;  %v652_v14 = vmul.f32 %v1576_v41, %v1874_v59  ;;  %v785_v41 = vld [vmem:[#allocation8 + $0x3b8] sm:$0xff]  ;;  %v1497_v2 = vpack.c.bf16 %v737_v51, %v736_v48 }
 0x160   :  { %v1580_v54 = vpop.eup %1579  ;;  %v651_v55 = vmul.f32 %v1578_v49, %v1876_v60  ;;  %v1931_v60 = vld [vmem:[#allocation8 + $0x3a0] sm:$0xff] }
 0x161   :  { %v1582_v3 = vpop.eup %1581  ;;  %v653_v5 = vmul.f32 %v1580_v54, %v1879_v1  ;;  %v466_v7 = vpop.f32.mrb[4].mxu0  ;;  %v1521_v1 = vpack.c.bf16 %v1917_v53, %v1915_v52  ;;  %v1523_v23 = vpack.c.bf16 %v1933_v47, %v1931_v60  ;;  %v768_v52 = vld [vmem:[#allocation8 + $0x330] sm:$0xff]  ;;  %v1527_v54 = vpack.c.bf16 %v785_v41, %v784_v40  ;;  %v771_v60 = vld [vmem:[#allocation8 + $0x348] sm:$0xff]  ;;  %v774_v41 = vld [vmem:[#allocation8 + $0x360] sm:$0xff] }
 0x162   :  { %v1584_v12 = vpop.eup %1583  ;;  %v1936_v15 = vadd.f32 %v466_v7, %v225_v42  ;;  %v543_v16 = vpop.f32.mrb[4].mxu1  ;;  %865 = vmatprep.mubr.f32.mxu0 %v651_v55  ;;  %v658_v27 = vmul.f32 %v1582_v3, %v1884_v6  ;;  %v769_v55 = vld [vmem:[#allocation8 + $0x338] sm:$0xff]  ;;  %v739_v7 = vld [vmem:[#allocation8 + $0x248] sm:$0xff]  ;;  %v756_v47 = vld [vmem:[#allocation8 + $0x2d0] sm:$0xff] }
 0x163   :  { %v468_v17 = vpop.f32.mrb[5].mxu0  ;;  %v1586_v18 = vpop.eup %1585  ;;  %v1943_v46 = vadd.f32 %v543_v16, %v1908_v50  ;;  %940 = vmatprep.mubr.f32.mxu1 %v653_v5  ;;  %866 = vmatmul.mubr.f32.vlgmr.msra.gmra.mrb[8].mxu0 %v650_v4  ;;  %v660_v32 = vmul.f32 %v1584_v12, %v1886_v9  ;;  %v1529_v3 = vpack.c.bf16 %v769_v55, %v768_v52  ;;  %v738_v5 = vld [vmem:[#allocation8 + $0x240] sm:$0xff]  ;;  %v757_v12 = vld [vmem:[#allocation8 + $0x2d8] sm:$0xff]  ;;  %v743_v40 = vld [vmem:[#allocation8 + $0x268] sm:$0xff] }
 0x164   :  { %v1946_v0 = vadd.f32 %v468_v17, %v1911_v44  ;;  %v545_v59 = vpop.f32.mrb[5].mxu1  ;;  %v1588_v20 = vpop.eup %1587  ;;  %v659_v61 = vmul.f32 %v1586_v18, %v1888_v10  ;;  %v1126_v21 = vmul.f32 -1.442695, %v1936_v15  ;;  %941 = vmatmul.mubr.f32.vlgmr.msra.gmra.mrb[8].mxu1 %v652_v14  ;;  %1486 = vmatpush3.bf16.msra.mxu0 %v1485_v58  ;;  %v755_v58 = vld [vmem:[#allocation8 + $0x2c8] sm:$0xff]  ;;  %v788_v14 = vld [vmem:[#allocation8 + $0x3d0] sm:$0xff]  ;;  %v789_v16 = vld [vmem:[#allocation8 + $0x3d8] sm:$0xff] }
 0x165   :  { %v1953_v22 = vadd.f32 %v545_v59, %v1921_v57  ;;  %v661_v28 = vmul.f32 %v1588_v20, %v1891_v13  ;;  %v1128_v29 = vmul.f32 -1.442695, %v1943_v46  ;;  %1518 = vmatpush3.bf16.msra.mxu1 %v1517_v62  ;;  %v472_v30 = vpop.f32.mrb[6].mxu0  ;;  %1488 = vmatprep.subr.bf16.mxu0 %v1487_v8  ;;  %v752_v13 = vld [vmem:[#allocation8 + $0x2b0] sm:$0xff]  ;;  %v786_v62 = vld [vmem:[#allocation8 + $0x3c0] sm:$0xff]  ;;  %v1535_v25 = vpack.c.bf16 %v789_v16, %v788_v14 }
 0x166   :  { %v1127_v10 = vmul.f32 -1.442695, %v1946_v0  ;;  %1589 = vpow2.f32 %v1126_v21  ;;  %v1963_v34 = vadd.f32 %v472_v30, %v225_v42  ;;  %v549_v35 = vpop.f32.mrb[6].mxu1  ;;  %870 = vmatprep.mubr.f32.mxu0 %v659_v61  ;;  %v474_v6 = vpop.f32.mrb[7].mxu0  ;;  %1520 = vmatprep.subr.bf16.mxu1 %v1519_v11  ;;  %v770_v8 = vld [vmem:[#allocation8 + $0x340] sm:$0xff]  ;;  %v1531_v11 = vpack.c.bf16 %v787_v63, %v786_v62  ;;  %v740_v20 = vld [vmem:[#allocation8 + $0x250] sm:$0xff] }
 0x167   :  { %v1129_v33 = vmul.f32 -1.442695, %v1953_v22  ;;  %1591 = vpow2.f32 %v1128_v29  ;;  %v1966_v37 = vadd.f32 %v549_v35, %v1908_v50  ;;  %945 = vmatprep.mubr.f32.mxu1 %v661_v28  ;;  %v1969_v38 = vadd.f32 %v474_v6, %v1911_v44  ;;  %v551_v9 = vpop.f32.mrb[7].mxu1  ;;  %871 = vmatmul.mubr.f32.gmra.mrb[10].mxu0 %v658_v27  ;;  %v741_v61 = vld [vmem:[#allocation8 + $0x258] sm:$0xff]  ;;  %v772_v21 = vld [vmem:[#allocation8 + $0x350] sm:$0xff]  ;;  %v758_v27 = vld [vmem:[#allocation8 + $0x2e0] sm:$0xff] }
 0x168   :  { %1593 = vpow2.f32 %v1127_v10  ;;  %v1134_v42 = vmul.f32 -1.442695, %v1963_v34  ;;  %v1973_v43 = vadd.f32 %v551_v9, %v1921_v57  ;;  %946 = vmatmul.mubr.f32.gmra.mrb[10].mxu1 %v660_v32  ;;  %1490 = vmatpush3.bf16.msra.mxu0 %v1489_v56  ;;  %v1495_v44 = vpack.c.bf16 %v753_v36, %v752_v13  ;;  %v754_v57 = vld [vmem:[#allocation8 + $0x2c0] sm:$0xff]  ;;  %v759_v28 = vld [vmem:[#allocation8 + $0x2e8] sm:$0xff]  ;;  %v744_v63 = vld [vmem:[#allocation8 + $0x270] sm:$0xff] }
 0x169   :  { %1595 = vpow2.f32 %v1129_v33  ;;  %v1136_v49 = vmul.f32 -1.442695, %v1966_v37  ;;  %v1135_v50 = vmul.f32 -1.442695, %v1969_v38  ;;  %1522 = vmatpush3.bf16.msra.mxu1 %v1521_v1  ;;  %1492 = vmatprep.subr.bf16.mxu0 %v1491_v19  ;;  %v1499_v4 = vpack.c.bf16 %v755_v58, %v754_v57  ;;  %v790_v30 = vld [vmem:[#allocation8 + $0x3e0] sm:$0xff] }
 0x16a   :  { %1597 = vpow2.f32 %v1134_v42  ;;  %v1137_v53 = vmul.f32 -1.442695, %v1973_v43  ;;  %1524 = vmatprep.subr.bf16.mxu1 %v1523_v23  ;;  %v1501_v56 = vpack.c.bf16 %v739_v7, %v738_v5  ;;  %v1533_v59 = vpack.c.bf16 %v771_v60, %v770_v8  ;;  %v777_v5 = vld [vmem:[#allocation8 + $0x378] sm:$0xff] }
 0x16b   :  { %1599 = vpow2.f32 %v1136_v49  ;;  %v1503_v19 = vpack.c.bf16 %v757_v12, %v756_v47  ;;  %v1505_v35 = vpack.c.bf16 %v741_v61, %v740_v20  ;;  %v1537_v36 = vpack.c.bf16 %v773_v26, %v772_v21  ;;  %v775_v49 = vld [vmem:[#allocation8 + $0x368] sm:$0xff] }
 0x16c   :  { %1601 = vpow2.f32 %v1135_v50  ;;  %1494 = vmatpush3.bf16.msra.mxu0 %v1493_v39  ;;  %v1507_v9 = vpack.c.bf16 %v759_v28, %v758_v27  ;;  %v742_v39 = vld [vmem:[#allocation8 + $0x260] sm:$0xff]  ;;  %v1539_v48 = vpack.c.bf16 %v791_v31, %v790_v30  ;;  %v760_v50 = vld [vmem:[#allocation8 + $0x2f0] sm:$0xff]  ;;  %v1541_v58 = vpack.c.bf16 %v775_v49, %v774_v41  ;;  %v1138_v21 = vld [vmem:[%s2008_s4] ss:$0 sm:$0xff]  ;;  %s1748_s4 = smov [#allocation10]  }
 0x16d   :  { %1603 = vpow2.f32 %v1137_v53  ;;  %1526 = vmatpush3.bf16.msra.mxu1 %v1525_v45  ;;  %1496 = vmatprep.subr.bf16.mxu0 %v1495_v44  ;;  %v761_v44 = vld [vmem:[#allocation8 + $0x2f8] sm:$0xff]  ;;  %v792_v53 = vld [vmem:[#allocation8 + $0x3f0] sm:$0xff]  ;;  %v1509_v57 = vpack.c.bf16 %v743_v40, %v742_v39  ;;  %s1108_s19 = sshll.u32 %s1748_s4, 4  ;;  %s1109_s19 = int_to_ptr.vmem [resolvable:$true] %s1108_s19 }
 0x16e   :  { %1528 = vmatprep.subr.bf16.mxu1 %v1527_v54  ;;  %v793_v54 = vld [vmem:[#allocation8 + $0x3f8] sm:$0xff]  ;;  %v1511_v62 = vpack.c.bf16 %v761_v44, %v760_v50  ;;  %s1709_s20 = scalar_lea.vmem %s1109_s19, 256  ;;  %p1714_p5 = scmp.lt.s32.totalorder %s1109_s19, %s1109_s19 }
 0x16f   :  { %p1710_p4 = scmp.ne.s32.totalorder %s1109_s19, %s1709_s20  ;;  %p1715_p6 = scmp.lt.s32.totalorder %s1709_s20, %s1709_s20 }
 0x170   :  { %v1590_v17 = vpop.eup %1589  ;;  %1498 = vmatpush3.bf16.msra.mxu0 %v1497_v2  ;;  %v745_v2 = vld [vmem:[#allocation8 + $0x278] sm:$0xff] }
 0x171   :  { %v1592_v1 = vpop.eup %1591  ;;  %v606_v18 = vadd.f32 1.0, %v1590_v17  ;;  %1530 = vmatpush3.bf16.msra.mxu1 %v1529_v3  ;;  %1500 = vmatprep.subr.bf16.mxu0 %v1499_v4  ;;  %v1543_v3 = vpack.c.bf16 %v793_v54, %v792_v53  ;;  %v776_v4 = vld [vmem:[#allocation8 + $0x370] sm:$0xff]  ;;  %v1513_v7 = vpack.c.bf16 %v745_v2, %v744_v63  ;;  %p1716_p7 = por %p1715_p6, %p1714_p5 }
 0x172   :  { %v1594_v23 = vpop.eup %1593  ;;  %v608_v24 = vadd.f32 1.0, %v1592_v1  ;;  %1532 = vmatprep.subr.bf16.mxu1 %v1531_v11  ;;  %v1545_v11 = vpack.c.bf16 %v777_v5, %v776_v4 }
 0x173   :  { %v1596_v29 = vpop.eup %1595  ;;  %1605 = vrcp.f32 %v606_v18  ;;  %v607_v10 = vadd.f32 1.0, %v1594_v23  ;;  %p1717_p8 = pnand %p1716_p7, %p1710_p4 }
 0x174   :  { %v1598_v32 = vpop.eup %1597  ;;  %1607 = vrcp.f32 %v608_v24  ;;  %v609_v33 = vadd.f32 1.0, %v1596_v29  ;;  %1502 = vmatpush3.bf16.msra.mxu0 %v1501_v56 }
 0x175   :  { %v1600_v6 = vpop.eup %1599  ;;  %1609 = vrcp.f32 %v607_v10  ;;  %v614_v13 = vadd.f32 1.0, %v1598_v32  ;;  %1534 = vmatpush3.bf16.msra.mxu1 %v1533_v59  ;;  %1504 = vmatprep.subr.bf16.mxu0 %v1503_v19 }
 0x176   :  { %v1602_v42 = vpop.eup %1601  ;;  %1611 = vrcp.f32 %v609_v33  ;;  %v616_v45 = vadd.f32 1.0, %v1600_v6  ;;  %1536 = vmatprep.subr.bf16.mxu1 %v1535_v25 }
 0x177   :  { %v1604_v51 = vpop.eup %1603  ;;  %1613 = vrcp.f32 %v614_v13  ;;  %v615_v52 = vadd.f32 1.0, %v1602_v42 }
 0x178   :  { %1615 = vrcp.f32 %v616_v45  ;;  %v617_v55 = vadd.f32 1.0, %v1604_v51  ;;  %1506 = vmatpush3.bf16.msra.mxu0 %v1505_v35 }
 0x179   :  { %1617 = vrcp.f32 %v615_v52  ;;  %1538 = vmatpush3.bf16.msra.mxu1 %v1537_v36  ;;  %1508 = vmatprep.subr.bf16.mxu0 %v1507_v9 }
 0x17a   :  { %1619 = vrcp.f32 %v617_v55  ;;  %1540 = vmatprep.subr.bf16.mxu1 %v1539_v48 }
 0x17c   :  { %1510 = vmatpush3.bf16.msra.mxu0 %v1509_v57 }
 0x17d   :  { %v1606_v8 = vpop.eup %1605  ;;  %1542 = vmatpush3.bf16.msra.mxu1 %v1541_v58  ;;  %1512 = vmatprep.subr.bf16.mxu0 %v1511_v62 }
 0x17e   :  { %v1608_v60 = vpop.eup %1607  ;;  %1544 = vmatprep.subr.bf16.mxu1 %v1543_v3  ;;  %v654_v17 = vmul.f32 %v1606_v8, %v1936_v15 }
 0x17f   :  { %v1610_v47 = vpop.eup %1609  ;;  %v656_v18 = vmul.f32 %v1608_v60, %v1943_v46 }
 0x180   :  { %v1612_v12 = vpop.eup %1611  ;;  %v655_v14 = vmul.f32 %v1610_v47, %v1946_v0  ;;  %1514 = vmatpush3.bf16.msra.mxu0 %v1513_v7 }
 0x181   :  { %v1614_v16 = vpop.eup %1613  ;;  %v657_v56 = vmul.f32 %v1612_v12, %v1953_v22  ;;  %1546 = vmatpush3.bf16.msra.mxu1 %v1545_v11 }
 0x182   :  { %v1616_v1 = vpop.eup %1615  ;;  %1015 = vmatprep.mubr.f32.mxu0 %v655_v14  ;;  %v662_v0 = vmul.f32 %v1614_v16, %v1963_v34 }
 0x183   :  { %v1618_v59 = vpop.eup %1617  ;;  %1090 = vmatprep.mubr.f32.mxu1 %v657_v56  ;;  %1016 = vmatmul.mubr.f32.vlgmr.msra.gmra.mrb[12].mxu0 %v654_v17  ;;  %v664_v15 = vmul.f32 %v1616_v1, %v1966_v37 }
 0x184   :  { %v1620_v19 = vpop.eup %1619  ;;  %v663_v20 = vmul.f32 %v1618_v59, %v1969_v38  ;;  %1091 = vmatmul.mubr.f32.vlgmr.msra.gmra.mrb[12].mxu1 %v656_v18 }
 0x185   :  { %v665_v61 = vmul.f32 %v1620_v19, %v1973_v43 }
 0x186   :  { %1020 = vmatprep.mubr.f32.mxu0 %v663_v20 }
 0x187   :  { %1095 = vmatprep.mubr.f32.mxu1 %v665_v61  ;;  %1021 = vmatmul.mubr.f32.gmra.mrb[14].mxu0 %v662_v0 }
 0x188   :  { %1096 = vmatmul.mubr.f32.gmra.mrb[14].mxu1 %v664_v15 }
 0x236   :  { %v1171_v22 = vpop.f32.mrb[8].mxu0 }
 0x237   :  { %v1209_v46 = vpop.f32.mrb[8].mxu1  ;;  %v1172_v23 = vpop.f32.mrb[9].mxu0 }
 0x238   :  { %v1173_v24 = vadd.f32 %v1172_v23, %v1171_v22  ;;  %v1210_v38 = vpop.f32.mrb[9].mxu1 }
 0x239   :  { %v1211_v25 = vadd.f32 %v1210_v38, %v1209_v46 }
 0x23a   :  { %v868_v26 = vadd.f32 %v1173_v24, %v1138_v21  ;;  %v1174_v34 = vpop.f32.mrb[10].mxu0 }
 0x23b   :  { %v1212_v27 = vpop.f32.mrb[10].mxu1  ;;  %v1175_v43 = vpop.f32.mrb[11].mxu0 }
 0x23c   :  { %v943_v28 = vadd.f32 %v1211_v25, %v868_v26  ;;  %v1176_v37 = vadd.f32 %v1175_v43, %v1174_v34  ;;  %v1213_v29 = vpop.f32.mrb[11].mxu1 }
 0x23d   :  { %v1214_v10 = vadd.f32 %v1213_v29, %v1212_v27 }
 0x23e   :  { %v873_v30 = vadd.f32 %v1176_v37, %v1138_v21 }
 0x240   :  { %v948_v31 = vadd.f32 %v1214_v10, %v873_v30 }
 0x256   :  { %v1247_v32 = vpop.f32.mrb[12].mxu0 }
 0x257   :  { %v1285_v33 = vpop.f32.mrb[12].mxu1  ;;  %v1248_v35 = vpop.f32.mrb[13].mxu0 }
 0x258   :  { %v1249_v6 = vadd.f32 %v1248_v35, %v1247_v32  ;;  %v1286_v13 = vpop.f32.mrb[13].mxu1 }
 0x259   :  { %v1287_v36 = vadd.f32 %v1286_v13, %v1285_v33 }
 0x25a   :  { %v1018_v9 = vadd.f32 %v1249_v6, %v943_v28  ;;  %v1250_v39 = vpop.f32.mrb[14].mxu0 }
 0x25b   :  { %v1288_v40 = vpop.f32.mrb[14].mxu1  ;;  %v1251_v41 = vpop.f32.mrb[15].mxu0 }
 0x25c   :  { %v1093_v42 = vadd.f32 %v1287_v36, %v1018_v9  ;;  %v1252_v45 = vadd.f32 %v1251_v41, %v1250_v39  ;;  %v1289_v48 = vpop.f32.mrb[15].mxu1 }
 0x25d   :  { %v1290_v49 = vadd.f32 %v1289_v48, %v1288_v40 }
 0x25e   :  { %1101 = vst [vmem:[#allocation10] sm:$0xff] %v1093_v42  ;;  %v1023_v50 = vadd.f32 %v1252_v45, %v948_v31 }
 0x260   :  { %v1098_v44 = vadd.f32 %v1290_v49, %v1023_v50 }
 0x262   :  { %1102 = vst [vmem:[#allocation10 + $0x8] sm:$0xff] %v1098_v44 }
 0x263   :  { %1720 = shalt.err (!%p1717_p8)
}
 0x264   :  { %s1721_s23 = scalar_lea.hbm %s2009_s5, 256 }
 0x265   :  { %p1722_p9 = scmp.ne.s32.totalorder %s2009_s5, %s1721_s23  ;;  %p1725_p10 = scmp.lt.u32.totalorder %s1721_s23, %s2009_s5 }
 0x267   :  { %p1727_p11 = pnand %p1725_p10, %p1722_p9 }
 0x269   :  { %1730 = shalt.err (!%p1727_p11)
}
 0x26a   :  { %1114 = dma.vmem_to_hbm [thread:$0]  %s1109_s19, 256, %s2009_s5, [#allocation4], %s1743_s1, %s1743_s1, %s1744_s17  }
 0x26b   :  { %1737 = dma.done.wait [#allocation4], 256  }
 0x26c   :  { %1738 = vsyncadd [#allocation4], 4294967040 }
 0x26d   :  { %1118 = vsyncpa [#allocation3], 1 }
 0x26e   :  { %1119 = vsyncpa [#allocation6], 1 }
 0x26f   :  { %1120 = vsyncpa [#allocation9], 1 }
 0x270   :  { %1121 = vsyncpa [#allocation4], 1 }

</bundles_post_ra>
